<compile_context>
chip_gen: v5e
topology: v5e:2x2
jax: 0.10.0
libtpu: 0.0.40
codegen_flags: <defaults>
</compile_context>

<pallas_src>
import jax
import jax.numpy as jnp
from jax.experimental import pallas as pl
from jax.experimental.pallas import tpu as pltpu

_LANES = 128
_SUBLANES = 8
# 4096 rows * 128 lanes * 4 B = 2 MiB per f32 block (1 MiB bf16); 2 inputs x
# 2 pipeline buffers = 8 MiB f32 -> fits v5e/v6e/v7x with the explicit
# vmem_limit_bytes below.
_MAX_TILE_ROWS = 4096
# Leading "parallel" grid axis for the v7x dual-TensorCore split; on 1-TC
# chips (v5e/v6e) it is just one extra (cheap) sequential grid step.
_NUM_CORES = 2


def _round_up(x, m):
    return ((x + m - 1) // m) * m


def _cdiv(a, b):
    return (a + b - 1) // b


def _make_kernel(rows, tile_rows, steps_per_core, mask_rows):
    def kernel(mel_ref, mel_tgt_ref, sp_ref, st_ref, out_ref, acc_ref):
        c = pl.program_id(0)   # core / parallel axis
        i = pl.program_id(1)   # reduction steps within a core

        @pl.when(i == 0)
        def _init():
            acc_ref[...] = jnp.zeros_like(acc_ref)

        # mel MSE: per-lane partial sum-of-squares (VPU only); the cross-lane
        # reduce is deferred to the wrapper, so the inner loop stays
        # vld + (cast) + vsub + vmul + vadd -> mem-bound friendly.
        x = mel_ref[...].astype(jnp.float32)
        y = mel_tgt_ref[...].astype(jnp.float32)
        d = x - y
        if mask_rows:
            # Logical (unclamped) block index -> true row range; rows past the
            # real array (ragged last tile / clamped duplicate tile on core 1)
            # are zeroed BEFORE squaring.
            lb = c * steps_per_core + i
            row0 = lb * tile_rows
            rid = row0 + jax.lax.broadcasted_iota(jnp.int32, d.shape, 0)
            d = jnp.where(rid < rows, d, 0.0)
        acc_ref[...] += jnp.sum(d * d, axis=0, keepdims=True)

        @pl.when(i == steps_per_core - 1)
        def _finalize():
            sp = sp_ref[...]  # (3, L, 128): [duration_pred, energy_pred, pitch_pred]
            st = st_ref[...]  # (3, L, 128): [duration_tgt(f32), energy_tgt, pitch_tgt]

            # Padded lanes are zero in both slabs, so they contribute 0 to all
            # sums (log(0 + 1) = 0); the mean divides by the true count.
            dur_d = sp[0] - st[0]
            # log(x + 1) matches the PyTorch spec exactly (jnp.log1p would be a
            # slightly more accurate equivalent).
            en_d = sp[1] - jnp.log(st[1] + 1.0)
            pi_d = sp[2] - jnp.log(st[2] + 1.0)

            # One lane-dense (4, 128) store: row 0 = mel SSE lane partials for
            # this core's row range, rows 1-3 = dur/energy/pitch lane partials.
            out_ref[0, :, :] = jnp.concatenate(
                [acc_ref[...],
                 jnp.sum(jnp.abs(dur_d), axis=0, keepdims=True),
                 jnp.sum(en_d * en_d, axis=0, keepdims=True),
                 jnp.sum(pi_d * pi_d, axis=0, keepdims=True)],
                axis=0)

    return kernel


def fastspeech_loss(mel, duration_predicted, energy_predicted, pitch_predicted,
                    mel_target, duration_predictor_target, energy_target, pitch_target):
    """Returns (mel_loss, duration_loss, energy_loss, pitch_loss) as f32 scalars."""
    n_mel = int(mel.size)
    n_small = int(duration_predicted.size)

    # ---- mel slabs: NATIVE dtype, unpadded (rows, 128) view ----------------
    # (pad only when n_mel is not lane-aligned; the demo / typical mel sizes
    # hit the copy-free reshape path).
    def mel_slab(x):
        flat = jnp.ravel(x)
        if n_mel % _LANES != 0:
            flat = jnp.pad(flat, (0, _round_up(n_mel, _LANES) - n_mel))
        return flat.reshape(-1, _LANES)

    mel_s = mel_slab(mel)
    mel_t_s = mel_slab(mel_target)
    rows = int(mel_s.shape[0])

    # Balanced tiles: minimize zero/masked padding instead of rounding to a
    # fixed tile multiple.
    n_tiles = max(1, _cdiv(rows, _MAX_TILE_ROWS))
    if n_tiles == 1:
        tile_rows = rows                       # whole-array block (always legal)
    else:
        tile_rows = _round_up(_cdiv(rows, n_tiles), _SUBLANES)
    nb = _cdiv(rows, tile_rows)                # real number of row blocks
    spc = _cdiv(nb, _NUM_CORES)                # reduction steps per core
    # Masking needed iff the last block is ragged or nb doesn't split evenly
    # across cores (core 1 then re-reads a clamped block that is fully masked).
    mask_rows = (rows % tile_rows != 0) or (nb % _NUM_CORES != 0)

    # ---- pack the six small [B,S] tensors into two (3, L, 128) slabs -------
    p_lanes = _round_up(max(n_small, 1), _LANES)
    small_rows = p_lanes // _LANES

    def small_slab(xs):
        packed = []
        for x in xs:
            flat = jnp.ravel(x).astype(jnp.float32)   # handles duration_target.float()
            flat = jnp.pad(flat, (0, p_lanes - n_small))
            packed.append(flat.reshape(small_rows, _LANES))
        return jnp.stack(packed, axis=0)               # (3, L, 128)

    small_pred = small_slab([duration_predicted, energy_predicted, pitch_predicted])
    small_tgt = small_slab([duration_predictor_target, energy_target, pitch_target])

    kernel = _make_kernel(rows, tile_rows, spc, mask_rows)

    def mel_map(c, i):
        # Clamp so a (masked) over-run step on core 1 re-reads an in-bounds block.
        return (jnp.minimum(c * spc + i, nb - 1), 0)

    mel_bytes = int(mel_s.size) * mel_s.dtype.itemsize \
        + int(mel_t_s.size) * mel_t_s.dtype.itemsize
    cost = pl.CostEstimate(
        flops=3 * n_mel + 9 * n_small,
        transcendentals=2 * n_small,
        bytes_accessed=mel_bytes + 4 * int(small_pred.size + small_tgt.size)
        + 4 * _NUM_CORES * 4 * _LANES,
    )

    out = pl.pallas_call(
        kernel,
        out_shape=jax.ShapeDtypeStruct((_NUM_CORES, 4, _LANES), jnp.float32),
        grid_spec=pltpu.PrefetchScalarGridSpec(
            num_scalar_prefetch=0,
            grid=(_NUM_CORES, spc),
            in_specs=[
                pl.BlockSpec((tile_rows, _LANES), mel_map),
                pl.BlockSpec((tile_rows, _LANES), mel_map),
                # Small slabs: whole-array block, constant index -> resident in
                # VMEM, fetched once per core.
                pl.BlockSpec((3, small_rows, _LANES), lambda c, i: (0, 0, 0)),
                pl.BlockSpec((3, small_rows, _LANES), lambda c, i: (0, 0, 0)),
            ],
            # Per-core lane-partial output block, written once at finalize.
            out_specs=pl.BlockSpec((1, 4, _LANES), lambda c, i: (c, 0, 0)),
            scratch_shapes=[pltpu.VMEM((1, _LANES), jnp.float32)],
        ),
        compiler_params=pltpu.CompilerParams(
            dimension_semantics=("parallel", "arbitrary"),
            vmem_limit_bytes=32 * 1024 * 1024,
        ),
        cost_estimate=cost,
    )(mel_s, mel_t_s, small_pred, small_tgt)

    # Trivial wrapper-side combine (256 / 128 element reductions).
    inv_mel = 1.0 / float(n_mel)
    inv_small = 1.0 / float(n_small)
    mel_loss = jnp.sum(out[:, 0, :]) * inv_mel        # sum both cores' partials
    dur_loss = jnp.sum(out[0, 1, :]) * inv_small      # small losses from core 0
    en_loss = jnp.sum(out[0, 2, :]) * inv_small
    pi_loss = jnp.sum(out[0, 3, :]) * inv_small
    return mel_loss, dur_loss, en_loss, pi_loss


def _reference(mel, dur_p, en_p, pi_p, mel_t, dur_t, en_t, pi_t):
    mel_loss = jnp.mean((mel - mel_t) ** 2)
    dur_loss = jnp.mean(jnp.abs(dur_p - dur_t.astype(jnp.float32)))
    en_loss = jnp.mean((en_p - jnp.log(en_t + 1.0)) ** 2)
    pi_loss = jnp.mean((pi_p - jnp.log(pi_t + 1.0)) ** 2)
    return mel_loss, dur_loss, en_loss, pi_loss


if __name__ == "__main__":
    key = jax.random.PRNGKey(0)
    ks = jax.random.split(key, 8)

    B, T, N_MELS, S = 2, 8, 32, 8

    mel = jax.random.normal(ks[0], (B, T, N_MELS), dtype=jnp.float32)
    mel_target = jax.random.normal(ks[1], (B, T, N_MELS), dtype=jnp.float32)

    duration_predicted = jax.random.normal(ks[2], (B, S), dtype=jnp.float32)
    duration_predictor_target = jax.random.randint(ks[3], (B, S), 0, 10, dtype=jnp.int32)

    energy_predicted = jax.random.normal(ks[4], (B, S), dtype=jnp.float32)
    energy_target = jax.random.uniform(ks[5], (B, S), dtype=jnp.float32, minval=0.0, maxval=5.0)

    pitch_predicted = jax.random.normal(ks[6], (B, S), dtype=jnp.float32)
    pitch_target = jax.random.uniform(ks[7], (B, S), dtype=jnp.float32, minval=0.0, maxval=5.0)

    losses = fastspeech_loss(
        mel, duration_predicted, energy_predicted, pitch_predicted,
        mel_target, duration_predictor_target, energy_target, pitch_target)
    losses = jax.block_until_ready(losses)

    ref = _reference(
        mel, duration_predicted, energy_predicted, pitch_predicted,
        mel_target, duration_predictor_target, energy_target, pitch_target)

    for got, want in zip(losses, ref):
        assert jnp.allclose(got, want, rtol=1e-5, atol=1e-5), (got, want)

    print("KERNEL_OK")
</pallas_src>

<mosaic_0001>
module attributes {stable_mosaic.version = 11 : i64} {
  func.func @kernel(%arg0: i32, %arg1: i32, %arg2: memref<4x128xf32, #tpu.memory_space<vmem>>, %arg3: memref<4x128xf32, #tpu.memory_space<vmem>>, %arg4: memref<3x1x128xf32, #tpu.memory_space<vmem>>, %arg5: memref<3x1x128xf32, #tpu.memory_space<vmem>>, %arg6: memref<1x4x128xf32, #tpu.memory_space<vmem>>, %arg7: memref<1x128xf32, #tpu.memory_space<vmem>>) attributes {dimension_semantics = [#tpu.dimension_semantics<parallel>, #tpu.dimension_semantics<arbitrary>], iteration_bounds = array<i64: 2, 1>, scalar_prefetch = 0 : i64, scratch_operands = 1 : i64, tpu.core_type = #tpu.core_type<tc>, window_params = [{transform_indices = @transform_0, window_bounds = array<i64: 4, 128>}, {transform_indices = @transform_1, window_bounds = array<i64: 4, 128>}, {pipeline_mode = #tpu.pipeline_mode<synchronous>, transform_indices = @transform_2, window_bounds = array<i64: 3, 1, 128>}, {pipeline_mode = #tpu.pipeline_mode<synchronous>, transform_indices = @transform_3, window_bounds = array<i64: 3, 1, 128>}, {transform_indices = @transform_4, window_bounds = array<i64: 1, 4, 128>}]} {
    %c0_i32 = arith.constant 0 : i32
    %0 = arith.cmpi eq, %arg1, %c0_i32 : i32
    %1 = arith.extui %0 : i1 to i32
    %c0_i32_0 = arith.constant 0 : i32
    %2 = arith.cmpi ne, %1, %c0_i32_0 : i32
    scf.if %2 {
      %cst_12 = arith.constant 0.000000e+00 : f32
      %25 = vector.broadcast %cst_12 : f32 to vector<1x128xf32>
      %c0_13 = arith.constant 0 : index
      %c0_14 = arith.constant 0 : index
      %26 = vector.load %arg7[%c0_13, %c0_14] : memref<1x128xf32, #tpu.memory_space<vmem>>, vector<1x128xf32>
      tpu.vector_store %arg7[%c0_13, %c0_14], %25 {strides = array<i32>} : memref<1x128xf32, #tpu.memory_space<vmem>>, vector<1x128xf32>,
    } else {
    }
    %c0 = arith.constant 0 : index
    %c0_1 = arith.constant 0 : index
    %3 = vector.load %arg2[%c0, %c0_1] : memref<4x128xf32, #tpu.memory_space<vmem>>, vector<4x128xf32>
    %c0_2 = arith.constant 0 : index
    %c0_3 = arith.constant 0 : index
    %4 = vector.load %arg3[%c0_2, %c0_3] : memref<4x128xf32, #tpu.memory_space<vmem>>, vector<4x128xf32>
    %5 = arith.subf %3, %4 : vector<4x128xf32>
    %c1_i32 = arith.constant 1 : i32
    %6 = arith.muli %arg0, %c1_i32 : i32
    %7 = arith.addi %6, %arg1 : i32
    %c4_i32 = arith.constant 4 : i32
    %8 = arith.muli %7, %c4_i32 : i32
    %9 = tpu.iota {dimensions = array<i32: 0>} : vector<4x128xi32>
    %10 = vector.broadcast %8 : i32 to vector<4x128xi32>
    %11 = arith.addi %10, %9 : vector<4x128xi32>
    %c4_i32_4 = arith.constant 4 : i32
    %12 = vector.broadcast %c4_i32_4 : i32 to vector<4x128xi32>
    %13 = arith.cmpi slt, %11, %12 : vector<4x128xi32>
    %cst = arith.constant 0.000000e+00 : f32
    %14 = vector.broadcast %cst : f32 to vector<4x128xf32>
    %15 = arith.select %13, %5, %14 : vector<4x128xi1>, vector<4x128xf32>
    %c0_5 = arith.constant 0 : index
    %c0_6 = arith.constant 0 : index
    %16 = vector.load %arg7[%c0_5, %c0_6] : memref<1x128xf32, #tpu.memory_space<vmem>>, vector<1x128xf32>
    %17 = arith.mulf %15, %15 : vector<4x128xf32>
    %cst_7 = arith.constant dense<0.000000e+00> : vector<128xf32>
    %18 = vector.multi_reduction <add>, %17, %cst_7 [0] : vector<4x128xf32> to vector<128xf32>
    %19 = vector.shape_cast %18 : vector<128xf32> to vector<1x128xf32>
    %20 = arith.addf %16, %19 : vector<1x128xf32>
    %c0_8 = arith.constant 0 : index
    %c0_9 = arith.constant 0 : index
    %21 = vector.load %arg7[%c0_8, %c0_9] : memref<1x128xf32, #tpu.memory_space<vmem>>, vector<1x128xf32>
    tpu.vector_store %arg7[%c0_8, %c0_9], %20 {strides = array<i32>} : memref<1x128xf32, #tpu.memory_space<vmem>>, vector<1x128xf32>,
    %c0_i32_10 = arith.constant 0 : i32
    %22 = arith.cmpi eq, %arg1, %c0_i32_10 : i32
    %23 = arith.extui %22 : i1 to i32
    %c0_i32_11 = arith.constant 0 : i32
    %24 = arith.cmpi ne, %23, %c0_i32_11 : i32
    scf.if %24 {
      %c0_12 = arith.constant 0 : index
      %c0_13 = arith.constant 0 : index
      %c0_14 = arith.constant 0 : index
      %25 = vector.load %arg4[%c0_12, %c0_13, %c0_14] : memref<3x1x128xf32, #tpu.memory_space<vmem>>, vector<3x1x128xf32>
      %c0_15 = arith.constant 0 : index
      %c0_16 = arith.constant 0 : index
      %c0_17 = arith.constant 0 : index
      %26 = vector.load %arg5[%c0_15, %c0_16, %c0_17] : memref<3x1x128xf32, #tpu.memory_space<vmem>>, vector<3x1x128xf32>
      %27 = vector.extract_strided_slice %25 {offsets = [0, 0, 0], sizes = [1, 1, 128], strides = [1, 1, 1]} : vector<3x1x128xf32> to vector<1x1x128xf32>
      %28 = vector.shape_cast %27 : vector<1x1x128xf32> to vector<1x128xf32>
      %29 = vector.extract_strided_slice %26 {offsets = [0, 0, 0], sizes = [1, 1, 128], strides = [1, 1, 1]} : vector<3x1x128xf32> to vector<1x1x128xf32>
      %30 = vector.shape_cast %29 : vector<1x1x128xf32> to vector<1x128xf32>
      %31 = arith.subf %28, %30 : vector<1x128xf32>
      %32 = vector.extract_strided_slice %25 {offsets = [1, 0, 0], sizes = [1, 1, 128], strides = [1, 1, 1]} : vector<3x1x128xf32> to vector<1x1x128xf32>
      %33 = vector.shape_cast %32 : vector<1x1x128xf32> to vector<1x128xf32>
      %34 = vector.extract_strided_slice %26 {offsets = [1, 0, 0], sizes = [1, 1, 128], strides = [1, 1, 1]} : vector<3x1x128xf32> to vector<1x1x128xf32>
      %35 = vector.shape_cast %34 : vector<1x1x128xf32> to vector<1x128xf32>
      %cst_18 = arith.constant 1.000000e+00 : f32
      %36 = vector.broadcast %cst_18 : f32 to vector<1x128xf32>
      %37 = arith.addf %35, %36 : vector<1x128xf32>
      %38 = math.log %37 : vector<1x128xf32>
      %39 = arith.subf %33, %38 : vector<1x128xf32>
      %40 = vector.extract_strided_slice %25 {offsets = [2, 0, 0], sizes = [1, 1, 128], strides = [1, 1, 1]} : vector<3x1x128xf32> to vector<1x1x128xf32>
      %41 = vector.shape_cast %40 : vector<1x1x128xf32> to vector<1x128xf32>
      %42 = vector.extract_strided_slice %26 {offsets = [2, 0, 0], sizes = [1, 1, 128], strides = [1, 1, 1]} : vector<3x1x128xf32> to vector<1x1x128xf32>
      %43 = vector.shape_cast %42 : vector<1x1x128xf32> to vector<1x128xf32>
      %cst_19 = arith.constant 1.000000e+00 : f32
      %44 = vector.broadcast %cst_19 : f32 to vector<1x128xf32>
      %45 = arith.addf %43, %44 : vector<1x128xf32>
      %46 = math.log %45 : vector<1x128xf32>
      %47 = arith.subf %41, %46 : vector<1x128xf32>
      %c0_20 = arith.constant 0 : index
      %c0_21 = arith.constant 0 : index
      %48 = vector.load %arg7[%c0_20, %c0_21] : memref<1x128xf32, #tpu.memory_space<vmem>>, vector<1x128xf32>
      %49 = math.absf %31 : vector<1x128xf32>
      %cst_22 = arith.constant dense<0.000000e+00> : vector<128xf32>
      %50 = vector.multi_reduction <add>, %49, %cst_22 [0] : vector<1x128xf32> to vector<128xf32>
      %51 = vector.shape_cast %50 : vector<128xf32> to vector<1x128xf32>
      %52 = arith.mulf %39, %39 : vector<1x128xf32>
      %cst_23 = arith.constant dense<0.000000e+00> : vector<128xf32>
      %53 = vector.multi_reduction <add>, %52, %cst_23 [0] : vector<1x128xf32> to vector<128xf32>
      %54 = vector.shape_cast %53 : vector<128xf32> to vector<1x128xf32>
      %55 = arith.mulf %47, %47 : vector<1x128xf32>
      %cst_24 = arith.constant dense<0.000000e+00> : vector<128xf32>
      %56 = vector.multi_reduction <add>, %55, %cst_24 [0] : vector<1x128xf32> to vector<128xf32>
      %57 = vector.shape_cast %56 : vector<128xf32> to vector<1x128xf32>
      %58 = tpu.concatenate %48, %51, %54, %57 in 0 : vector<1x128xf32>, vector<1x128xf32>, vector<1x128xf32>, vector<1x128xf32> -> vector<4x128xf32>
      %c0_25 = arith.constant 0 : index
      %c0_26 = arith.constant 0 : index
      %c0_27 = arith.constant 0 : index
      %59 = vector.load %arg6[%c0_25, %c0_26, %c0_27] : memref<1x4x128xf32, #tpu.memory_space<vmem>>, vector<1x4x128xf32>
      %60 = vector.shape_cast %59 : vector<1x4x128xf32> to vector<4x128xf32>
      %61 = vector.shape_cast %58 : vector<4x128xf32> to vector<1x4x128xf32>
      tpu.vector_store %arg6[%c0_25, %c0_26, %c0_27], %61 {strides = array<i32>} : memref<1x4x128xf32, #tpu.memory_space<vmem>>, vector<1x4x128xf32>,
    } else {
    }
    return
  }
  func.func @transform_0(%arg0: i32, %arg1: i32) -> (i32, i32) {
    %c1_i32 = arith.constant 1 : i32
    %0 = arith.muli %arg0, %c1_i32 : i32
    %1 = arith.addi %0, %arg1 : i32
    %c0_i32 = arith.constant 0 : i32
    %2 = arith.minsi %1, %c0_i32 : i32
    %c0_i32_0 = arith.constant 0 : i32
    %c0_i32_1 = arith.constant 0 : i32
    return %2, %c0_i32_0 : i32, i32
  }
  func.func @transform_1(%arg0: i32, %arg1: i32) -> (i32, i32) {
    %c1_i32 = arith.constant 1 : i32
    %0 = arith.muli %arg0, %c1_i32 : i32
    %1 = arith.addi %0, %arg1 : i32
    %c0_i32 = arith.constant 0 : i32
    %2 = arith.minsi %1, %c0_i32 : i32
    %c0_i32_0 = arith.constant 0 : i32
    %c0_i32_1 = arith.constant 0 : i32
    return %2, %c0_i32_0 : i32, i32
  }
  func.func @transform_2(%arg0: i32, %arg1: i32) -> (i32, i32, i32) {
    %c0_i32 = arith.constant 0 : i32
    %c0_i32_0 = arith.constant 0 : i32
    %c0_i32_1 = arith.constant 0 : i32
    %c0_i32_2 = arith.constant 0 : i32
    return %c0_i32, %c0_i32_0, %c0_i32_1 : i32, i32, i32
  }
  func.func @transform_3(%arg0: i32, %arg1: i32) -> (i32, i32, i32) {
    %c0_i32 = arith.constant 0 : i32
    %c0_i32_0 = arith.constant 0 : i32
    %c0_i32_1 = arith.constant 0 : i32
    %c0_i32_2 = arith.constant 0 : i32
    return %c0_i32, %c0_i32_0, %c0_i32_1 : i32, i32, i32
  }
  func.func @transform_4(%arg0: i32, %arg1: i32) -> (i32, i32, i32) {
    %c0_i32 = arith.constant 0 : i32
    %c0_i32_0 = arith.constant 0 : i32
    %c0_i32_1 = arith.constant 0 : i32
    return %arg0, %c0_i32, %c0_i32_0 : i32, i32, i32
  }
}

</mosaic_0001>

<bundles_post_ra>
// kernel: tpu_custom_call.1
= control target key start
LH: loop header
LB: loop body
LE: loop exit
PB: predicated region body
PF: predicated region fallthrough
CT: control target
= control target key end

     0   :  { %s1128_s0 = inlined_call_operand.hbm [shape: f32[4,128], index: 0, kind: input, shape index: {}]   ;;  %s1129_s1 = inlined_call_operand.hbm [shape: f32[4,128], index: 1, kind: input, shape index: {}]   ;;  %s1130_s2 = inlined_call_operand.hbm [shape: f32[3,1,128], index: 2, kind: input, shape index: {}]   ;;  %s1131_s3 = inlined_call_operand.hbm [shape: f32[3,1,128], index: 3, kind: input, shape index: {}]   ;;  %s1132_s4 = inlined_call_operand.hbm [shape: f32[2,4,128], index: 4, kind: output, shape index: {}]  }
   0x1   :  { %1134 = sst [smem:[#allocation18_spill]] %s1130_s2 }
   0x2   :  { %1135 = sst [smem:[#allocation19_spill]] %s1131_s3 }
   0x3   :  { %9 = vsyncpa [#allocation4], 0 }
   0x4   :  { %11 = vsyncpa [#allocation4 + $0x1], 0 }
   0x5   :  { %12 = vsyncpa [#allocation7], 0 }
   0x6   :  { %14 = vsyncpa [#allocation7 + $0x1], 0 }
   0x7   :  { %15 = vsyncpa [#allocation10], 0 }
   0x8   :  { %16 = vsyncpa [#allocation5], 0 }
   0x9   :  { %18 = vsyncpa [#allocation5 + $0x1], 0  ;;  %s937_s15 = smov 0   ;;  %s939_s16 = smov 0  }
   0xa   :  { %s941_s17 = smov 0   ;;  %s943_s18 = smov 0  }
   0xb   :  { %s945_s19 = smov 0   ;;  %s947_s20 = smov 0  }
   0xc   :  { %s949_s21 = smov 0   ;;  %s951_s22 = smov 0  }
   0xd LB: > { %s978_s23 = sadd.s32 4294967295, %s903_s22   ;;  %s529_s24 = sadd.s32 4294967294, %s903_s22   ;;  %s903_s22 = sphi %s951_s22, %s24_s22   ;;  %s899_s21 = sphi %s949_s21, %s1150_s21   ;;  %s895_s20 = sphi %s947_s20, %s1149_s20   ;;  %s891_s19 = sphi %s945_s19, %s1118_s19   ;;  %s887_s18 = sphi %s943_s18, %s1148_s18   ;;  %s883_s17 = sphi %s941_s17, %s1147_s17   ;;  %s879_s16 = sphi %s939_s16, %s1146_s16   ;;  %s875_s15 = sphi %s937_s15, %s1145_s15  }
   0xe   : > { %p63_p0 = scmp.eq.s32.totalorder %s978_s23, 0  ;;  %p159_p1 = scmp.ne.s32.totalorder %s883_s17, %s879_s16 }
   0xf   : > { %p160_p2 = scmp.eq.s32.totalorder %s978_s23, 1  ;;  %p165_p3 = scmp.ne.s32.totalorder %s879_s16, %s875_s15 }
  0x10   : > { %p166_p4 = scmp.eq.s32.totalorder %s529_s24, 1  ;;  %p530_p5 = scmp.ge.s32.totalorder %s903_s22, 1 }
  0x11   : > { %p988_p6 = por %p160_p2, %p159_p1  ;;  %p173_p7 = scmp.lt.s32.totalorder %s903_s22, 3 }
  0x12   : > { %p993_p8 = por %p166_p4, %p165_p3  ;;  %s1139_s2 = sld [smem:[#allocation18_spill]] }
  0x13   : > { %p997_p9 = pnand %p530_p5, %p173_p7  ;;  %s905_s5 = smov [#allocation8]  }
  0x14   : > { %s186_s6 = sshll.u32 %s905_s5, 4  ;;  %p533_p12 = scmp.ge.s32.totalorder %s903_s22, 2  ;;  %s187_s6 = int_to_ptr.vmem [resolvable:$true] %s186_s6 }
  0x15   : > { %p563_p10 = pneg %p997_p9  ;;  %s1140_s3 = sld [smem:[#allocation19_spill]] }
  0x16   : > { %s906_s10 = smov 16   ;;  %s907_s11 = smov 1  }
  0x17   : > { %p564_p11 = pnand %p563_p10, %p63_p0  ;;  %s908_s12 = smov [#allocation9]  }
  0x18   : > { %s184_s30 = sshll.u32 %s1139_s2, 4  ;;  %s200_s13 = sshll.u32 %s908_s12, 4  ;;  %s185_s30 = int_to_ptr.hbm [resolvable:$true] %s184_s30  ;;  %s201_s13 = int_to_ptr.vmem [resolvable:$true] %s200_s13 }
  0x19   : > { %566 = dma.hbm_to_vmem [thread:$0]  (!%p564_p11), %s185_s30, 48, %s187_s6, [#allocation7], %s906_s10, %s906_s10, %s907_s11  }
  0x1a   : > { %s36_s14 = sadd.s32 1, %s899_s21  ;;  %p872_p1 = scmp.ne.s32.totalorder %s891_s19, 0 }
  0x1b   : > { %s198_s9 = sshll.u32 %s1140_s3, 4  ;;  %p38_p13 = scmp.ge.s32.totalorder %s36_s14, 2  ;;  %s199_s9 = int_to_ptr.hbm [resolvable:$true] %s198_s9 }
  0x1c   : > { %569 = dma.hbm_to_vmem [thread:$0]  (!%p564_p11), %s199_s9, 48, %s201_s13, [#allocation10], %s906_s10, %s906_s10, %s907_s11  }
  0x1d   : > { %s1152_s14 = smov (%p38_p13, %s36_s14), 0  ;;  %p57_p2 = scmp.eq.s32.totalorder %s903_s22, 0 }
  0x1e   : > { %1141 = sst [smem:[#allocation17_spill]] %s1152_s14  ;;  %p62_p3 = scmp.ne.s32.totalorder %s891_s19, %s887_s18 }
  0x1f   : > { %s146_s24 = ssub.s32 %s899_s21, %s1152_s14  ;;  %p58_p4 = por %p872_p1, %p57_p2 }
  0x20   : > { %p1023_p5 = por %p63_p0, %p62_p3  ;;  %p147_p7 = scmp.eq.s32.totalorder %s146_s24, 0 }
  0x21   : > { %s149_s29 = sadd.s32 1, %s883_s17  ;;  %p583_p10 = scmp.lt.s32.totalorder %s903_s22, 2 }
  0x22   : > { %s1029_s30 = scalar_select %p147_p7, %s883_s17, %s149_s29  }
  0x23   : > { %s909_s5 = smov [#allocation3]   ;;  %s227_s9 = sshll.u32 %s1128_s0, 4  ;;  %s228_s9 = int_to_ptr.hbm [resolvable:$true] %s227_s9 }
  0x24   : > { %s229_s6 = sshll.u32 %s909_s5, 4  ;;  %p1035_p11 = pnand %p583_p10, %p58_p4  ;;  %s230_s6 = int_to_ptr.vmem [resolvable:$true] %s229_s6 }
  0x25   : > { %s236_s10 = sand.u32 1, %s903_s22   ;;  %s728_s11 = sshra.s32 %s228_s9, 4  ;;  %s729_s11 = int_to_ptr.hbm [resolvable:$true] %s728_s11 }
  0x26   : > { %s730_s12 = scalar_lea.hbm %s729_s11, 4  ;;  %p732_p1 = pneg %p1035_p11 }
  0x27   : > { %p731_p13 = scmp.ne.s32.totalorder %s729_s11, %s730_s12  ;;  %s735_s29 = scalar_lea.hbm %s1128_s0, 4 }
  0x28   : > { %p737_p4 = scmp.lt.s32.totalorder %s735_s29, %s730_s12 }
  0x29   : > { %p733_p2 = pnand %p732_p1, %p731_p13 }
  0x2b   : > { %p734_p3 = pneg %p733_p2 }
  0x2d   : > { %p739_p7 = pnand %p737_p4, %p734_p3 }
  0x2f   : > { %742 = shalt.err (!%p739_p7)
}
  0x30   : > { %573 = dma.hbm_to_vmem [thread:$0]  (!%p1035_p11), %s228_s9, 64, %s230_s6, [#allocation4]  }
  0x31   : > { %s249_s8 = sshll.u32 %s1129_s1, 4  ;;  %s910_s11 = smov [#allocation6]   ;;  %s250_s8 = int_to_ptr.hbm [resolvable:$true] %s249_s8 }
  0x32   : > { %s251_s2 = sshll.u32 %s910_s11, 4  ;;  %s237_s3 = scalar_lea.sflag [#allocation7], %s236_s10  ;;  %s252_s2 = int_to_ptr.vmem [resolvable:$true] %s251_s2 }
  0x33   : > { %s758_s14 = sshra.s32 %s250_s8, 4  ;;  %s765_s6 = scalar_lea.hbm %s1129_s1, 4  ;;  %s759_s14 = int_to_ptr.hbm [resolvable:$true] %s758_s14 }
  0x34   : > { %s760_s13 = scalar_lea.hbm %s759_s14, 4 }
  0x35   : > { %p761_p10 = scmp.ne.s32.totalorder %s759_s14, %s760_s13  ;;  %p767_p3 = scmp.lt.s32.totalorder %s765_s6, %s760_s13 }
  0x37   : > { %p763_p13 = pnand %p761_p10, %p732_p1 }
  0x39   : > { %p764_p2 = pneg %p763_p13 }
  0x3b   : > { %p769_p4 = pnand %p767_p3, %p764_p2 }
  0x3d   : > { %772 = shalt.err (!%p769_p4)
}
  0x3e   : > { %576 = dma.hbm_to_vmem [thread:$0]  (!%p1035_p11), %s250_s8, 64, %s252_s2, %s237_s3  }
  0x3f   : > { %260 = sbr.rel (%p997_p9) target bundleno = 115 (0x73), region = 36  ;;  %s262_s14 = sand.u32 (!%p997_p9), 1, %s891_s19  }
  0x40   : > { %s539_s9 = sshll.u32 (!%p997_p9), %s262_s14, 2  ;;  %s263_s10 = scalar_lea.sflag (!%p997_p9), [#allocation4], %s262_s14 }
  0x41   : > { %s266_s29 = scalar_lea.vmem (!%p997_p9), [#allocation3], %s539_s9 }
  0x44   : > { %853 = dma.done.wait (%p1023_p5), %s263_s10, 64  }
  0x45   : > { %855 = vsyncadd (%p1023_p5), %s263_s10, 4294967232  ;;  %s272_s5 = sand.u32 1, %s978_s23   ;;  %s276_s18 = scalar_lea.vmem [#allocation6], %s539_s9 }
  0x46   : > { %s273_s7 = scalar_lea.sflag [#allocation7], %s272_s5 }
  0x47   : > { %857 = dma.done.wait (%p1023_p5), %s273_s7, 64  }
  0x48   : > { %859 = vsyncadd (%p1023_p5), %s273_s7, 4294967232 }
  0x49   : > { %861 = dma.done.wait (%p63_p0), [#allocation7], 48  }
  0x4a   : > { %863 = vsyncadd (%p63_p0), [#allocation7], 4294967248 }
  0x4b   : > { %865 = dma.done.wait (%p63_p0), [#allocation10], 48  }
  0x4c   : > { %867 = vsyncadd (%p63_p0), [#allocation10], 4294967248  ;;  %s544_s2 = sshll.u32 %s895_s20, 2  ;;  %v333_v0 = vlaneseq  ;;  %v911_v1 = vmov 0.0   ;;  %v328_v5 = vld [vmem:[%s266_s29] sm:$0xf] }
  0x4d   : > { %327 = vst [vmem:[#allocation2] sm:$0x1] %v911_v1  ;;  %v335_v2 = vstv %s544_s2  ;;  %v329_v6 = vld [vmem:[%s276_s18] sm:$0xf]  ;;  %v358_v8 = vld [vmem:[#allocation9 + $0x1] sm:$0x1]  ;;  %s403_s8 = scalar_lea.hbm %s1132_s4, %s544_s2 }
  0x4e   : > { %v334_v3 = vshrl.u32 %v333_v0, 7  ;;  %v330_v7 = vsub.f32 %v328_v5, %v329_v6  ;;  %v359_v9 = vld [vmem:[#allocation9 + $0x2] sm:$0x1]  ;;  %vm341_vm1 = vcmask 1043456   ;;  %v361_v11 = vadd.f32 1.0, %v358_v8  ;;  %s314_s3 = sand.u32 1, %s879_s16  }
  0x4f   : > { %v365_v12 = vadd.f32 1.0, %v359_v9  ;;  %v354_v21 = vld [vmem:[#allocation8] sm:$0x1]  ;;  %v357_v22 = vld [vmem:[#allocation9] sm:$0x1]  ;;  %s543_s23 = sshll.u32 %s314_s3, 2 }
  0x50   : > { %v336_v4 = vadd.s32 %v335_v2, %v334_v3  ;;  %664 = vlog2.f32 %v361_v11  ;;  %v355_v25 = vld [vmem:[#allocation8 + $0x1] sm:$0x1]  ;;  %v356_v28 = vld [vmem:[#allocation8 + $0x2] sm:$0x1]  ;;  %v360_v30 = vsub.f32 %v354_v21, %v357_v22  ;;  %vm385_vm2 = vcmask 1040384   ;;  %s316_s11 = scalar_lea.vmem [#allocation11], %s543_s23 }
  0x51   : > { %666 = vlog2.f32 %v365_v12  ;;  %vm387_vm3 = vcmask 1041408   ;;  %s405_s13 = sshll.u32 %s316_s11, 4  ;;  %s407_s12 = sshll.u32 %s403_s8, 4  ;;  %vm389_vm4 = vcmask 1042432   ;;  %s406_s13 = int_to_ptr.vmem [resolvable:$true] %s405_s13  ;;  %s408_s12 = int_to_ptr.hbm [resolvable:$true] %s407_s12 }
  0x52   : > { %vm337_vm0 = vcmp.lt.s32.totalorder %v336_v4, 4  ;;  %v370_v34 = vand.u32 2147483647, %v360_v30  ;;  %s393_s20 = scalar_lea.sflag [#allocation5], %s314_s3  ;;  %s802_s24 = sshra.s32 %s408_s12, 4  ;;  %s803_s24 = int_to_ptr.hbm [resolvable:$true] %s802_s24 }
  0x53   : > { %v338_v10 = vsel %vm337_vm0, %v330_v7, 0.0  ;;  %s804_s6 = scalar_lea.hbm %s803_s24, 4  ;;  %s808_s10 = scalar_lea.hbm %s1132_s4, 8 }
  0x54   : > { %v340_v13 = vmul.f32 %v338_v10, %v338_v10  ;;  %v339_v27 = vld [vmem:[#allocation2] sm:$0x1]  ;;  %v377_v37 = vperm.slane %v370_v34, 0  ;;  %p805_p0 = scmp.ne.s32.totalorder %s803_s24, %s804_s6  ;;  %p809_p11 = scmp.lt.s32.totalorder %s803_s24, %s1132_s4 }
  0x55   : > { %p810_p1 = scmp.lt.s32.totalorder %s808_s10, %s804_s6 }
  0x56   : > { %v342_v14 = vsel %vm341_vm1, %v340_v13, 0.0  ;;  %v665_v17 = vpop.eup %664  ;;  %p806_p9 = pnand %p805_p0, %p988_p6 }
  0x57   : > { %v343_v15 = vrot.slane %v342_v14, 4  ;;  %v667_v19 = vpop.eup %666  ;;  %v363_v23 = vmul.f32 0.6931472, %v665_v17  ;;  %p811_p7 = por %p810_p1, %p809_p11 }
  0x58   : > { %v367_v26 = vmul.f32 0.6931472, %v667_v19  ;;  %p807_p5 = pneg %p806_p9 }
  0x59   : > { %v344_v16 = vadd.f32 %v343_v15, %v342_v14  ;;  %v364_v31 = vsub.f32 %v355_v25, %v363_v23 }
  0x5a   : > { %v368_v33 = vsub.f32 %v356_v28, %v367_v26  ;;  %p812_p10 = pnand %p811_p7, %p807_p5 }
  0x5b   : > { %v345_v18 = vrot.slane %v344_v16, 2  ;;  %v372_v35 = vmul.f32 %v364_v31, %v364_v31 }
  0x5c   : > { %v374_v36 = vmul.f32 %v368_v33, %v368_v33 }
  0x5d   : > { %v346_v20 = vadd.f32 %v345_v18, %v344_v16  ;;  %v380_v38 = vperm.slane %v372_v35, 0 }
  0x5e   : > { %v383_v39 = vperm.slane %v374_v36, 0 }
  0x5f   : > { %v347_v24 = vrot.slane %v346_v20, 1 }
  0x61   : > { %v348_v29 = vadd.f32 %v347_v24, %v346_v20 }
  0x63   : > { %v349_v32 = vadd.f32 %v348_v29, %v339_v27 }
  0x65   : > { %350 = vst [vmem:[#allocation2] sm:$0x1] %v349_v32 }
  0x6c   : > { %v369_v40 = vld [vmem:[#allocation2] sm:$0x1] }
  0x6d   : > { %v386_v41 = vsel %vm385_vm2, %v369_v40, %v377_v37 }
  0x6e   : > { %v388_v42 = vsel %vm387_vm3, %v386_v41, %v380_v38 }
  0x6f   : > { %v390_v43 = vsel %vm389_vm4, %v388_v42, %v383_v39 }
  0x70   : > { %391 = vst [vmem:[%s316_s11] sm:$0xf] %v390_v43 }
  0x71   : > { %815 = shalt.err (!%p812_p10)
}
  0x72   : > { %561 = dma.vmem_to_hbm [thread:$0]  (%p988_p6), %s406_s13, 64, %s408_s12, %s393_s20  }
  0x73 PF: > { %s419_s7 = sand.u32 1, %s875_s15   ;;  %p578_p13 = pnand %p533_p12, %p993_p8 }
  0x74   : > { %s420_s18 = scalar_lea.sflag [#allocation5], %s419_s7 }
  0x75   : > { %p579_p2 = pneg %p578_p13 }
  0x77   : > { %869 = dma.done.wait (%p579_p2), %s420_s18, 64  }
  0x78   : > { %871 = vsyncadd (%p579_p2), %s420_s18, 4294967232  ;;  %s24_s22 = sadd.s32 1, %s903_s22   ;;  %s1144_s25 = sld [smem:[#allocation17_spill]] }
  0x79   : > { %p21_p3 = scmp.ge.s32.totalorder %s24_s22, 4   ;;  %s1145_s15 = smov %s879_s16 }
  0x7a   : > { %s1146_s16 = smov %s883_s17  ;;  %s1147_s17 = smov %s1029_s30 }
  0x7b   : > { %s1148_s18 = smov %s891_s19  ;;  %s1118_s19 = smov 0  }
  0x7c   : > { %s1149_s20 = smov %s899_s21  ;;  %23 = sbr.rel (!%p21_p3) target bundleno = 13 (0xd), region = 110 }
  0x7e   : > { %s1150_s21 = smov %s1144_s25 }
  0x81   :  { %426 = vsyncpa [#allocation4], 1 }
  0x82   :  { %428 = vsyncpa [#allocation4 + $0x1], 1 }
  0x83   :  { %429 = vsyncpa [#allocation7], 1 }
  0x84   :  { %431 = vsyncpa [#allocation7 + $0x1], 1 }
  0x85   :  { %432 = vsyncpa [#allocation10], 1 }
  0x86   :  { %433 = vsyncpa [#allocation5], 1 }
  0x87   :  { %435 = vsyncpa [#allocation5 + $0x1], 1 }

</bundles_post_ra>
